<compile_context>
chip_gen: v7x
topology: tpu7x:2x2x1
jax: 0.10.0
libtpu: 0.0.40
codegen_flags: <defaults>
</compile_context>

<pallas_src>
import jax
import jax.numpy as jnp
from jax.experimental import pallas as pl
from jax.experimental.pallas import tpu as pltpu

IN_DIM, H1, H2, OUT_DIM = 784, 256, 128, 10
OUT_PAD = 128   # lane-dense logits (unmasked vst); wrapper slices back to OUT_DIM
MIN_TILE = 16   # sublane multiple that is safe for both f32 (8) and bf16 (16) tiles


def _cdiv(a, b):
    return (a + b - 1) // b


def _round_up(x, m):
    return _cdiv(x, m) * m


def mlp_kernel(x_ref, w1_ref, b1_ref, w2_ref, b2_ref, w3_ref, b3_ref, o_ref):
    # Cast the streamed activations in-kernel (free on the VPU) so the wrapper
    # never materializes a padded/casted copy of x in HBM.
    x = x_ref[...].astype(w1_ref.dtype)
    # fc1: MXU matmul with f32 accumulation, bias + ReLU epilogue in f32 (VPU).
    h1 = jnp.dot(x, w1_ref[...], preferred_element_type=jnp.float32)
    h1 = jnp.maximum(h1 + b1_ref[...], 0.0).astype(w2_ref.dtype)
    # dropout(p=0.3) -> identity in eval mode
    # fc2 + ReLU
    h2 = jnp.dot(h1, w2_ref[...], preferred_element_type=jnp.float32)
    h2 = jnp.maximum(h2 + b2_ref[...], 0.0).astype(w3_ref.dtype)
    # dropout(p=0.3) -> identity in eval mode
    # fc3 (logits padded to 128 lanes; extra columns of w3/b3 are zero)
    logits = jnp.dot(h2, w3_ref[...], preferred_element_type=jnp.float32) + b3_ref[...]
    o_ref[...] = logits.astype(o_ref.dtype)


def prepare_params(w1, b1, w2, b2, w3, b3, *, compute_dtype=jnp.bfloat16):
    """One-time parameter prep (pad fc3 to 128 output lanes, cast weights).

    Hoisted out of the per-call path so latency-sensitive small-batch calls do
    not repeat the pad/cast XLA ops.  Biases stay f32 (epilogue runs in f32).
    """
    w1p = w1.astype(compute_dtype)
    w2p = w2.astype(compute_dtype)
    w3p = jnp.pad(w3, ((0, 0), (0, OUT_PAD - OUT_DIM))).astype(compute_dtype)
    b1f = b1.reshape(1, H1).astype(jnp.float32)
    b2f = b2.reshape(1, H2).astype(jnp.float32)
    b3p = jnp.pad(b3.reshape(1, OUT_DIM).astype(jnp.float32),
                  ((0, 0), (0, OUT_PAD - OUT_DIM)))
    return w1p, b1f, w2p, b2f, w3p, b3p


def mlp_forward(x, params, *, batch_tile=1024, out_dtype=None):
    """Fused MLP forward. Returns (B, 10) logits (dtype defaults to x.dtype)."""
    w1, b1, w2, b2, w3, b3 = params
    B, F = x.shape
    assert F == IN_DIM
    compute_dtype = w1.dtype
    out_dtype = x.dtype if out_dtype is None else out_dtype

    # Batch tile: large enough to hide the ~0.35 us per-grid-step overhead,
    # capped so (a) it never exceeds the sublane-rounded batch and (b) the grid
    # has >= 2 blocks when the batch allows it (v7x megacore sharding).
    tile = min(batch_tile, _round_up(B, MIN_TILE))
    if B > MIN_TILE:
        tile = min(tile, _round_up(_cdiv(B, 2), MIN_TILE))
    tile = max(MIN_TILE, _round_up(tile, MIN_TILE))
    grid = (_cdiv(B, tile),)   # no batch padding: ragged last block is masked

    def resident(shape):
        # Constant index map -> fetched once, stays resident in VMEM.
        # (pl.Buffered(1) would drop the dead second buffer; only relevant when
        #  pushing tiles toward v7x's VMEM ceiling, so left at the default.)
        return pl.BlockSpec(shape, lambda i: (0, 0))

    cbytes = jnp.dtype(compute_dtype).itemsize
    flops = 2 * B * (IN_DIM * H1 + H1 * H2 + H2 * OUT_PAD)
    bytes_accessed = (
        B * IN_DIM * x.dtype.itemsize                        # activations (unpadded)
        + (IN_DIM * H1 + H1 * H2 + H2 * OUT_PAD) * cbytes    # weights
        + (H1 + H2 + OUT_PAD) * 4                            # biases (f32)
        + B * OUT_PAD * jnp.dtype(out_dtype).itemsize        # logits out
    )

    out = pl.pallas_call(
        mlp_kernel,
        out_shape=jax.ShapeDtypeStruct((B, OUT_PAD), out_dtype),
        grid_spec=pltpu.PrefetchScalarGridSpec(
            num_scalar_prefetch=0,
            grid=grid,
            in_specs=[
                pl.BlockSpec((tile, IN_DIM), lambda i: (i, 0)),   # streamed x, unpadded
                resident((IN_DIM, H1)),
                resident((1, H1)),
                resident((H1, H2)),
                resident((1, H2)),
                resident((H2, OUT_PAD)),
                resident((1, OUT_PAD)),
            ],
            out_specs=pl.BlockSpec((tile, OUT_PAD), lambda i: (i, 0)),
        ),
        compiler_params=pltpu.CompilerParams(
            dimension_semantics=("parallel",),
        ),
        cost_estimate=pl.CostEstimate(
            flops=flops, transcendentals=0, bytes_accessed=bytes_accessed
        ),
    )(x, w1, b1, w2, b2, w3, b3)

    # Only the lane padding of the logits needs stripping (no batch padding).
    return out[:, :OUT_DIM]


def mlp_reference(x, w1, b1, w2, b2, w3, b3, *, compute_dtype=jnp.float32):
    """Pure-JAX reference with the same operand dtypes as the kernel."""
    xc = x.astype(compute_dtype)
    h1 = jnp.maximum(
        jnp.dot(xc, w1.astype(compute_dtype),
                preferred_element_type=jnp.float32) + b1, 0.0
    ).astype(compute_dtype)
    h2 = jnp.maximum(
        jnp.dot(h1, w2.astype(compute_dtype),
                preferred_element_type=jnp.float32) + b2, 0.0
    ).astype(compute_dtype)
    return jnp.dot(h2, w3.astype(compute_dtype),
                   preferred_element_type=jnp.float32) + b3


def init_params(key):
    """Deterministic init mimicking PyTorch nn.Linear default (U[-1/sqrt(fan_in), +])."""
    ks = jax.random.split(key, 6)

    def linear(kw, kb, fan_in, fan_out):
        bound = 1.0 / jnp.sqrt(fan_in)
        w = jax.random.uniform(kw, (fan_in, fan_out), jnp.float32, -bound, bound)
        b = jax.random.uniform(kb, (1, fan_out), jnp.float32, -bound, bound)
        return w, b

    w1, b1 = linear(ks[0], ks[1], IN_DIM, H1)
    w2, b2 = linear(ks[2], ks[3], H1, H2)
    w3, b3 = linear(ks[4], ks[5], H2, OUT_DIM)
    return w1, b1, w2, b2, w3, b3


if __name__ == "__main__":
    key = jax.random.PRNGKey(0)
    k_params, k_x = jax.random.split(key)

    raw_params = init_params(k_params)
    x = jax.random.normal(k_x, (32, IN_DIM), jnp.float32)  # small flattened-MNIST batch

    # f32 path: tight correctness check against the pure-JAX reference.
    params_f32 = prepare_params(*raw_params, compute_dtype=jnp.float32)
    out_f32 = jax.block_until_ready(mlp_forward(x, params_f32))
    ref_f32 = mlp_reference(x, *raw_params, compute_dtype=jnp.float32)
    assert out_f32.shape == (32, OUT_DIM)
    assert out_f32.dtype == jnp.float32
    assert jnp.allclose(out_f32, ref_f32, atol=1e-4, rtol=1e-4)

    # bf16 fast path (default prep): bf16 x in HBM (cast upstream), bf16
    # weights, f32 MXU accumulation, bf16 logits out.  Compared against a
    # reference that applies the same operand casts.
    x_bf16 = x.astype(jnp.bfloat16)
    params_bf16 = prepare_params(*raw_params)   # compute_dtype=bfloat16 default
    out_bf16 = jax.block_until_ready(mlp_forward(x_bf16, params_bf16))
    ref_bf16 = mlp_reference(x_bf16, *raw_params, compute_dtype=jnp.bfloat16)
    assert out_bf16.shape == (32, OUT_DIM)
    assert out_bf16.dtype == jnp.bfloat16
    assert jnp.allclose(out_bf16.astype(jnp.float32), ref_bf16, atol=5e-2, rtol=5e-2)

    print("KERNEL_OK")
</pallas_src>

<mosaic_0001>
module attributes {stable_mosaic.version = 11 : i64} {
  func.func @mlp_kernel(%arg0: i32, %arg1: memref<16x784xf32, #tpu.memory_space<vmem>>, %arg2: memref<784x256xf32, #tpu.memory_space<vmem>>, %arg3: memref<1x256xf32, #tpu.memory_space<vmem>>, %arg4: memref<256x128xf32, #tpu.memory_space<vmem>>, %arg5: memref<1x128xf32, #tpu.memory_space<vmem>>, %arg6: memref<128x128xf32, #tpu.memory_space<vmem>>, %arg7: memref<1x128xf32, #tpu.memory_space<vmem>>, %arg8: memref<16x128xf32, #tpu.memory_space<vmem>>) attributes {dimension_semantics = [#tpu.dimension_semantics<parallel>], iteration_bounds = array<i64: 2>, scalar_prefetch = 0 : i64, scratch_operands = 0 : i64, tpu.core_type = #tpu.core_type<tc>, window_params = [{transform_indices = @transform_0, window_bounds = array<i64: 16, 784>}, {pipeline_mode = #tpu.pipeline_mode<synchronous>, transform_indices = @transform_1, window_bounds = array<i64: 784, 256>}, {pipeline_mode = #tpu.pipeline_mode<synchronous>, transform_indices = @transform_2, window_bounds = array<i64: 1, 256>}, {pipeline_mode = #tpu.pipeline_mode<synchronous>, transform_indices = @transform_3, window_bounds = array<i64: 256, 128>}, {pipeline_mode = #tpu.pipeline_mode<synchronous>, transform_indices = @transform_4, window_bounds = array<i64: 1, 128>}, {pipeline_mode = #tpu.pipeline_mode<synchronous>, transform_indices = @transform_5, window_bounds = array<i64: 128, 128>}, {pipeline_mode = #tpu.pipeline_mode<synchronous>, transform_indices = @transform_6, window_bounds = array<i64: 1, 128>}, {transform_indices = @transform_7, window_bounds = array<i64: 16, 128>}]} {
    %c0 = arith.constant 0 : index
    %c0_0 = arith.constant 0 : index
    %0 = vector.load %arg1[%c0, %c0_0] : memref<16x784xf32, #tpu.memory_space<vmem>>, vector<16x784xf32>
    %c0_1 = arith.constant 0 : index
    %c0_2 = arith.constant 0 : index
    %1 = vector.load %arg2[%c0_1, %c0_2] : memref<784x256xf32, #tpu.memory_space<vmem>>, vector<784x256xf32>
    %cst = arith.constant dense<0.000000e+00> : vector<16x256xf32>
    %2 = tpu.matmul %0, %1, %cst {dimension_numbers = #tpu.dot_dimension_numbers<[1], [0], [0], [1], [0, 0, 1, 1], [], []>} : vector<16x784xf32>, vector<784x256xf32>, vector<16x256xf32> -> vector<16x256xf32>
    %c0_3 = arith.constant 0 : index
    %c0_4 = arith.constant 0 : index
    %3 = vector.load %arg3[%c0_3, %c0_4] : memref<1x256xf32, #tpu.memory_space<vmem>>, vector<1x256xf32>
    %4 = vector.broadcast %3 : vector<1x256xf32> to vector<16x256xf32>
    %5 = arith.addf %2, %4 : vector<16x256xf32>
    %cst_5 = arith.constant 0.000000e+00 : f32
    %6 = vector.broadcast %cst_5 : f32 to vector<16x256xf32>
    %7 = arith.maximumf %5, %6 : vector<16x256xf32>
    %c0_6 = arith.constant 0 : index
    %c0_7 = arith.constant 0 : index
    %8 = vector.load %arg4[%c0_6, %c0_7] : memref<256x128xf32, #tpu.memory_space<vmem>>, vector<256x128xf32>
    %cst_8 = arith.constant dense<0.000000e+00> : vector<16x128xf32>
    %9 = tpu.matmul %7, %8, %cst_8 {dimension_numbers = #tpu.dot_dimension_numbers<[1], [0], [0], [1], [0, 0, 1, 1], [], []>} : vector<16x256xf32>, vector<256x128xf32>, vector<16x128xf32> -> vector<16x128xf32>
    %c0_9 = arith.constant 0 : index
    %c0_10 = arith.constant 0 : index
    %10 = vector.load %arg5[%c0_9, %c0_10] : memref<1x128xf32, #tpu.memory_space<vmem>>, vector<1x128xf32>
    %11 = vector.broadcast %10 : vector<1x128xf32> to vector<16x128xf32>
    %12 = arith.addf %9, %11 : vector<16x128xf32>
    %cst_11 = arith.constant 0.000000e+00 : f32
    %13 = vector.broadcast %cst_11 : f32 to vector<16x128xf32>
    %14 = arith.maximumf %12, %13 : vector<16x128xf32>
    %c0_12 = arith.constant 0 : index
    %c0_13 = arith.constant 0 : index
    %15 = vector.load %arg6[%c0_12, %c0_13] : memref<128x128xf32, #tpu.memory_space<vmem>>, vector<128x128xf32>
    %cst_14 = arith.constant dense<0.000000e+00> : vector<16x128xf32>
    %16 = tpu.matmul %14, %15, %cst_14 {dimension_numbers = #tpu.dot_dimension_numbers<[1], [0], [0], [1], [0, 0, 1, 1], [], []>} : vector<16x128xf32>, vector<128x128xf32>, vector<16x128xf32> -> vector<16x128xf32>
    %c0_15 = arith.constant 0 : index
    %c0_16 = arith.constant 0 : index
    %17 = vector.load %arg7[%c0_15, %c0_16] : memref<1x128xf32, #tpu.memory_space<vmem>>, vector<1x128xf32>
    %18 = vector.broadcast %17 : vector<1x128xf32> to vector<16x128xf32>
    %19 = arith.addf %16, %18 : vector<16x128xf32>
    %c0_17 = arith.constant 0 : index
    %c0_18 = arith.constant 0 : index
    %20 = vector.load %arg8[%c0_17, %c0_18] : memref<16x128xf32, #tpu.memory_space<vmem>>, vector<16x128xf32>
    tpu.vector_store %arg8[%c0_17, %c0_18], %19 {strides = array<i32>} : memref<16x128xf32, #tpu.memory_space<vmem>>, vector<16x128xf32>,
    return
  }
  func.func @transform_0(%arg0: i32) -> (i32, i32) {
    %c0_i32 = arith.constant 0 : i32
    %c0_i32_0 = arith.constant 0 : i32
    return %arg0, %c0_i32 : i32, i32
  }
  func.func @transform_1(%arg0: i32) -> (i32, i32) {
    %c0_i32 = arith.constant 0 : i32
    %c0_i32_0 = arith.constant 0 : i32
    %c0_i32_1 = arith.constant 0 : i32
    return %c0_i32, %c0_i32_0 : i32, i32
  }
  func.func @transform_2(%arg0: i32) -> (i32, i32) {
    %c0_i32 = arith.constant 0 : i32
    %c0_i32_0 = arith.constant 0 : i32
    %c0_i32_1 = arith.constant 0 : i32
    return %c0_i32, %c0_i32_0 : i32, i32
  }
  func.func @transform_3(%arg0: i32) -> (i32, i32) {
    %c0_i32 = arith.constant 0 : i32
    %c0_i32_0 = arith.constant 0 : i32
    %c0_i32_1 = arith.constant 0 : i32
    return %c0_i32, %c0_i32_0 : i32, i32
  }
  func.func @transform_4(%arg0: i32) -> (i32, i32) {
    %c0_i32 = arith.constant 0 : i32
    %c0_i32_0 = arith.constant 0 : i32
    %c0_i32_1 = arith.constant 0 : i32
    return %c0_i32, %c0_i32_0 : i32, i32
  }
  func.func @transform_5(%arg0: i32) -> (i32, i32) {
    %c0_i32 = arith.constant 0 : i32
    %c0_i32_0 = arith.constant 0 : i32
    %c0_i32_1 = arith.constant 0 : i32
    return %c0_i32, %c0_i32_0 : i32, i32
  }
  func.func @transform_6(%arg0: i32) -> (i32, i32) {
    %c0_i32 = arith.constant 0 : i32
    %c0_i32_0 = arith.constant 0 : i32
    %c0_i32_1 = arith.constant 0 : i32
    return %c0_i32, %c0_i32_0 : i32, i32
  }
  func.func @transform_7(%arg0: i32) -> (i32, i32) {
    %c0_i32 = arith.constant 0 : i32
    %c0_i32_0 = arith.constant 0 : i32
    return %arg0, %c0_i32 : i32, i32
  }
}

</mosaic_0001>

<bundles_post_ra>
// kernel: tpu_custom_call.1
= control target key start
LH: loop header
LB: loop body
LE: loop exit
PB: predicated region body
PF: predicated region fallthrough
CT: control target
= control target key end

     0   :  { %s2225_s0 = inlined_call_operand.hbm [shape: f32[32,784], index: 0, kind: input, shape index: {}]   ;;  %s2226_s1 = inlined_call_operand.hbm [shape: f32[784,256], index: 1, kind: input, shape index: {}]   ;;  %s2227_s2 = inlined_call_operand.vmem [shape: f32[1,256], index: 2, kind: input, shape index: {}]   ;;  %s2228_s3 = inlined_call_operand.hbm [shape: f32[256,128], index: 3, kind: input, shape index: {}]   ;;  %s2229_s4 = inlined_call_operand.vmem [shape: f32[1,128], index: 4, kind: input, shape index: {}]   ;;  %s2230_s5 = inlined_call_operand.hbm [shape: f32[128,128], index: 5, kind: input, shape index: {}]   ;;  %s2231_s6 = inlined_call_operand.vmem [shape: f32[1,128], index: 6, kind: input, shape index: {}]   ;;  %s2232_s7 = inlined_call_operand.hbm [shape: f32[32,128], index: 7, kind: output, shape index: {}]  }
   0x1   :  { %2237 = sst [smem:[#allocation16_spill]] %s2226_s1 }
   0x2   :  { %12 = vsyncpa [#allocation3], 0 }
   0x3   :  { %14 = vsyncpa [#allocation3 + $0x1], 0 }
   0x4   :  { %15 = vsyncpa [#allocation6], 0 }
   0x5   :  { %16 = vsyncpa [#allocation9], 0 }
   0x6   :  { %17 = vsyncpa [#allocation4], 0 }
   0x7   :  { %19 = vsyncpa [#allocation4 + $0x1], 0  ;;  %s1941_s24 = smov 0   ;;  %s1943_s25 = smov 0  }
   0x8   :  { %s1945_s26 = smov 0   ;;  %s1947_s27 = smov 0  }
   0x9 LB: > { %s1962_s28 = sadd.s32 4294967295, %s1885_s27   ;;  %s1217_s29 = sadd.s32 4294967294, %s1885_s27   ;;  %s1885_s27 = sphi %s1947_s27, %s2260_s27   ;;  %s1881_s26 = sphi %s1945_s26, %s2259_s26   ;;  %s1877_s25 = sphi %s1943_s25, %s2258_s25   ;;  %s1873_s24 = sphi %s1941_s24, %s2257_s24  }
   0xa   : > { %p45_p0 = scmp.ne.s32.totalorder %s1877_s25, %s1873_s24  ;;  %p2233_p1 = scmp.eq.s32.totalorder %s1962_s28, 0 }
   0xb   : > { %p201_p3 = scmp.eq.s32.totalorder %s1217_s29, 1  ;;  %p1218_p5 = scmp.ge.s32.totalorder %s1885_s27, 1 }
   0xc   : > { %p1971_p4 = por %p2233_p1, %p45_p0  ;;  %p208_p7 = scmp.lt.s32.totalorder %s1885_s27, 3 }
   0xd   : > { %p1976_p6 = por %p201_p3, %p45_p0  ;;  %s1887_s10 = smov [#allocation5]  }
   0xe   : > { %s2238_s30 = scalar_select %p1971_p4, 1, 0 }
   0xf   : > { %s2239_s8 = scalar_select %p1976_p6, 1, 0 }
  0x10   : > { %p1981_p8 = pnand %p1218_p5, %p208_p7  ;;  %s220_s11 = sshll.u32 %s1887_s10, 4  ;;  %s1985_s11 = int_to_ptr.vmem [resolvable:$true] %s220_s11 }
  0x11   : > { %2240 = sst [smem:[#allocation15_spill]] %s2239_s8  ;;  %s1888_s13 = smov [#allocation7]  }
  0x12   : > { %s2241_s9 = scalar_select %p1981_p8, 1, 0 }
  0x13   : > { %p1627_p9 = pneg %p1981_p8  ;;  %s236_s14 = sshll.u32 %s1888_s13, 4  ;;  %s1996_s14 = int_to_ptr.vmem [resolvable:$true] %s236_s14 }
  0x14   : > { %s2243_s1 = sld [smem:[#allocation16_spill]] }
  0x15   : > { %p1992_p11 = pnand %p1627_p9, %p2233_p1 }
  0x17   : > { %p2006_p13 = pneg %p1992_p11 }
  0x1a   : > { %s1697_s17 = scalar_lea.hbm %s2243_s1, 25088 }
  0x1b   : > { %p1698_p12 = scmp.ne.s32.totalorder %s2243_s1, %s1697_s17  ;;  %p1704_p5 = scmp.lt.u32.totalorder %s1697_s17, %s2243_s1 }
  0x1d   : > { %p1700_p0 = pnand %p2006_p13, %p1698_p12 }
  0x1f   : > { %p1701_p3 = pneg %p1700_p0 }
  0x21   : > { %p1706_p7 = pnand %p1704_p5, %p1701_p3 }
  0x23   : > { %1709 = shalt.err (!%p1706_p7)
}
  0x24   : > { %s1710_s23 = scalar_lea.vmem %s1985_s11, 25088  ;;  %p1718_p2 = scmp.lt.s32.totalorder %s1985_s11, %s1985_s11 }
  0x25   : > { %p1711_p9 = scmp.ne.s32.totalorder %s1985_s11, %s1710_s23  ;;  %p1719_p6 = scmp.lt.s32.totalorder %s1710_s23, %s1710_s23 }
  0x27   : > { %p1713_p10 = pnand %p1711_p9, %p2006_p13  ;;  %p1720_p12 = por %p1719_p6, %p1718_p2 }
  0x29   : > { %p1714_p1 = pneg %p1713_p10 }
  0x2b   : > { %p1721_p0 = pnand %p1720_p12, %p1714_p1 }
  0x2d   : > { %1724 = shalt.err (!%p1721_p0)
}
  0x2e   : > { %s1889_s29 = smov 256   ;;  %s1890_s10 = smov 16  }
  0x2f   : > { %1630 = dma.hbm_to_vmem [thread:$0]  (!%p1992_p11), %s2243_s1, 25088, %s1985_s11, [#allocation6], %s1889_s29, %s1889_s29, %s1890_s10  }
  0x30   : > { %s1725_s18 = scalar_lea.hbm %s2228_s3, 4096 }
  0x31   : > { %p1726_p2 = scmp.ne.s32.totalorder %s2228_s3, %s1725_s18  ;;  %p1732_p10 = scmp.lt.u32.totalorder %s1725_s18, %s2228_s3 }
  0x33   : > { %p1728_p1 = pnand %p1726_p2, %p2006_p13 }
  0x35   : > { %p1729_p6 = pneg %p1728_p1 }
  0x37   : > { %p1734_p3 = pnand %p1732_p10, %p1729_p6 }
  0x39   : > { %1737 = shalt.err (!%p1734_p3)
}
  0x3a   : > { %s1738_s11 = scalar_lea.vmem %s1996_s14, 4096  ;;  %p1746_p12 = scmp.lt.s32.totalorder %s1996_s14, %s1996_s14 }
  0x3b   : > { %p1739_p5 = scmp.ne.s32.totalorder %s1996_s14, %s1738_s11  ;;  %p1747_p0 = scmp.lt.s32.totalorder %s1738_s11, %s1738_s11 }
  0x3d   : > { %p1741_p7 = pnand %p1739_p5, %p2006_p13  ;;  %p1748_p2 = por %p1747_p0, %p1746_p12 }
  0x3f   : > { %p1742_p9 = pneg %p1741_p7 }
  0x41   : > { %p1749_p1 = pnand %p1748_p2, %p1742_p9 }
  0x43   : > { %1752 = shalt.err (!%p1749_p1)
}
  0x44   : > { %s1891_s29 = smov 128   ;;  %s1892_s10 = smov 8  }
  0x45   : > { %1633 = dma.hbm_to_vmem [thread:$0]  (!%p1992_p11), %s2228_s3, 4096, %s1996_s14, [#allocation6], %s1891_s29, %s1891_s29, %s1892_s10  }
  0x46   : > { %s1893_s16 = smov [#allocation8]   ;;  %s2051_s18 = sadd.s32 1, %s1885_s27  }
  0x47   : > { %s252_s17 = sshll.u32 %s1893_s16, 4  ;;  %s1753_s22 = scalar_lea.hbm %s2230_s5, 2048  ;;  %s253_s17 = int_to_ptr.vmem [resolvable:$true] %s252_s17 }
  0x48   : > { %p1754_p6 = scmp.ne.s32.totalorder %s2230_s5, %s1753_s22  ;;  %p1760_p5 = scmp.lt.u32.totalorder %s1753_s22, %s2230_s5 }
  0x4a   : > { %p1756_p10 = pnand %p1754_p6, %p2006_p13 }
  0x4c   : > { %p1757_p3 = pneg %p1756_p10 }
  0x4e   : > { %p1762_p7 = pnand %p1760_p5, %p1757_p3 }
  0x50   : > { %1765 = shalt.err (!%p1762_p7)
}
  0x51   : > { %s1766_s14 = scalar_lea.vmem %s253_s17, 2048  ;;  %p1774_p2 = scmp.lt.s32.totalorder %s253_s17, %s253_s17 }
  0x52   : > { %p1767_p9 = scmp.ne.s32.totalorder %s253_s17, %s1766_s14  ;;  %p1775_p1 = scmp.lt.s32.totalorder %s1766_s14, %s1766_s14 }
  0x54   : > { %p1769_p12 = pnand %p1767_p9, %p2006_p13  ;;  %p1776_p4 = por %p1775_p1, %p1774_p2 }
  0x56   : > { %p1770_p0 = pneg %p1769_p12 }
  0x58   : > { %p1777_p8 = pnand %p1776_p4, %p1770_p0 }
  0x5a   : > { %1780 = shalt.err (!%p1777_p8)
}
  0x5b   : > { %1636 = dma.hbm_to_vmem [thread:$0]  (!%p1992_p11), %s2230_s5, 2048, %s253_s17, [#allocation9], %s1891_s29, %s1891_s29, %s1892_s10  }
  0x5c   : > { %s29_s1 = ssub.s32 %s1885_s27, %s2051_s18  ;;  %s32_s8 = sadd.s32 1, %s1881_s26 }
  0x5d   : > { %p30_p4 = scmp.eq.s32.totalorder %s29_s1, 0  ;;  %p39_p8 = scmp.ne.s32.totalorder %s1881_s26, %s1877_s25 }
  0x5e   : > { %p40_p13 = scmp.eq.s32.totalorder %s1885_s27, 0  ;;  %p1648_p6 = scmp.lt.s32.totalorder %s1885_s27, 2 }
  0x5f   : > { %s2079_s12 = scalar_select %p30_p4, %s1881_s26, %s32_s8  }
  0x60   : > { %p41_p10 = por %p40_p13, %p39_p8  ;;  %p2245_p3 = scmp.eq.s32.totalorder %s1962_s28, 1 }
  0x61   : > { %s269_s16 = sand.u32 1, %s1881_s26   ;;  %s1609_s19 = smul.u32 1792, %s1885_s27 }
  0x62   : > { %p2083_p5 = por %p2245_p3, %p39_p8  ;;  %s1608_s21 = smul.u32 112, %s269_s16 }
  0x63   : > { %s2092_s29 = scalar_lea.hbm %s2225_s0, %s1609_s19  ;;  %p2094_p11 = pnand %p1648_p6, %p41_p10 }
  0x64   : > { %s273_s17 = scalar_lea.vmem [#allocation2], %s1608_s21  ;;  %s2100_s14 = scalar_lea.sflag [#allocation3], %s269_s16 }
  0x65   : > { %s281_s11 = sshll.u32 %s273_s17, 4  ;;  %s1781_s13 = scalar_lea.hbm %s2092_s29, 1792  ;;  %s2098_s11 = int_to_ptr.vmem [resolvable:$true] %s281_s11 }
  0x66   : > { %p1782_p7 = scmp.ne.s32.totalorder %s2092_s29, %s1781_s13  ;;  %p1783_p9 = pneg %p2094_p11 }
  0x67   : > { %s1786_s8 = scalar_lea.hbm %s2225_s0, 3584  ;;  %p1787_p2 = scmp.lt.u32.totalorder %s2092_s29, %s2225_s0 }
  0x68   : > { %p1784_p12 = pnand %p1783_p9, %p1782_p7  ;;  %p1788_p1 = scmp.lt.u32.totalorder %s1786_s8, %s1781_s13 }
  0x69   : > { %p1790_p8 = scmp.lt.u32.totalorder %s1781_s13, %s2092_s29 }
  0x6a   : > { %p1785_p0 = pneg %p1784_p12  ;;  %p1789_p4 = por %p1788_p1, %p1787_p2 }
  0x6c   : > { %p1791_p13 = por %p1790_p8, %p1789_p4 }
  0x6e   : > { %p1792_p6 = pnand %p1791_p13, %p1785_p0 }
  0x70   : > { %1795 = shalt.err (!%p1792_p6)
}
  0x71   : > { %s1796_s16 = scalar_lea.vmem %s2098_s11, 1792  ;;  %s1894_s21 = smov [#allocation2]  }
  0x72   : > { %p1797_p10 = scmp.ne.s32.totalorder %s2098_s11, %s1796_s16  ;;  %s1801_s23 = sshll.u32 %s1894_s21, 4  ;;  %s1802_s23 = int_to_ptr.vmem [resolvable:$false] %s1801_s23 }
  0x73   : > { %s1803_s17 = scalar_lea.vmem %s1802_s23, 3584  ;;  %p1804_p12 = scmp.lt.s32.totalorder %s2098_s11, %s1802_s23 }
  0x74   : > { %p1799_p3 = pnand %p1797_p10, %p1783_p9  ;;  %p1805_p2 = scmp.lt.s32.totalorder %s1803_s17, %s1796_s16 }
  0x76   : > { %p1800_p7 = pneg %p1799_p3  ;;  %p1806_p1 = por %p1805_p2, %p1804_p12 }
  0x78   : > { %p1807_p4 = pnand %p1806_p1, %p1800_p7 }
  0x7a   : > { %1810 = shalt.err (!%p1807_p4)
}
  0x7b   : > { %s1895_s13 = smov 896   ;;  %s1896_s15 = smov 56  }
  0x7c   : > { %1640 = dma.hbm_to_vmem [thread:$0]  (!%p2094_p11), %s2092_s29, 1792, %s2098_s11, %s2100_s14, %s1895_s13, %s1895_s13, %s1896_s15  }
  0x7d   : > { %p2248_p9 = scmp.ne.s32.totalorder %s2241_s9, 0 }
  0x7e   : > { %s2131_s1 = sand.u32 (!%p2248_p9), 1, %s1877_s25   ;;  %p2249_p0 = scmp.ne.s32.totalorder (!%p2248_p9), %s2238_s30, 0 }
  0x7f   : > { %293 = sbr.rel (%p2248_p9) target bundleno = 946 (0x3b2), region = 48  ;;  %s296_s19 = scalar_lea.sflag (!%p2248_p9), [#allocation3], %s2131_s1 }
  0x80   : > { %s1610_s8 = smul.u32 (!%p2248_p9), 112, %s2131_s1 }
  0x82   : > { %s2135_s22 = scalar_lea.vmem (!%p2248_p9), [#allocation2], %s1610_s8 }
  0x86   : > { %1856 = dma.done.wait (%p2249_p0), %s296_s19, 1792  }
  0x87   : > { %1858 = vsyncadd (%p2249_p0), %s296_s19, 4294965504  ;;  %p2250_p11 = scmp.eq.s32.totalorder %s1962_s28, 0 }
  0x89   : > { %1860 = dma.done.wait (%p2250_p11), [#allocation6], 29184   ;;  %p2251_p8 = pmov %p2250_p11 }
  0x8b   : > { %1862 = vsyncadd (%p2251_p8), [#allocation6], 4294938112  ;;  %p2252_p13 = pmov %p2251_p8 }
  0x8c   : > { %p2253_p6 = pmov %p2251_p8 }
  0x8d   : > { %1864 = dma.done.wait (%p2252_p13), [#allocation9], 2048  }
  0x8e   : > { %1866 = vsyncadd (%p2253_p6), [#allocation9], 4294965248  ;;  %v423_v0 = vld [vmem:[#allocation5 + $0x208] sm:$0xff]  ;;  %v425_v1 = vld [vmem:[#allocation5 + $0x218] sm:$0xff]  ;;  %vm566_vm0 = vcmask 130048   ;;  %s1230_s11 = sshll.u32 %s2131_s1, 4 }
  0x8f   : > { %v422_v2 = vld [vmem:[#allocation5 + $0x200] sm:$0xff]  ;;  %v1396_v3 = vpack.c.bf16 %v425_v1, %v423_v0  ;;  %v424_v4 = vld [vmem:[#allocation5 + $0x210] sm:$0xff]  ;;  %v427_v5 = vld [vmem:[#allocation5 + $0x228] sm:$0xff]  ;;  %s341_s14 = scalar_lea.vmem [#allocation10], %s1230_s11  ;;  %s1240_s17 = sshll.u32 %s1962_s28, 8 }
  0x90   : > { %v429_v6 = vld [vmem:[#allocation5 + $0x238] sm:$0xff]  ;;  %v1398_v7 = vpack.c.bf16 %v424_v4, %v422_v2  ;;  %v426_v9 = vld [vmem:[#allocation5 + $0x220] sm:$0xff]  ;;  %v428_v10 = vld [vmem:[#allocation5 + $0x230] sm:$0xff]  ;;  %s1115_s16 = sshll.u32 %s341_s14, 4  ;;  %s2181_s8 = scalar_lea.hbm %s2232_s7, %s1240_s17  ;;  %s2176_s16 = int_to_ptr.vmem [resolvable:$true] %s1115_s16 }
  0x91   : > { %v1400_v8 = vpack.c.bf16 %v429_v6, %v427_v5  ;;  %v431_v11 = vld [vmem:[#allocation5 + $0x248] sm:$0xff]  ;;  %1397 = vmatprep.subr.bf16.mxu0 %v1396_v3  ;;  %v433_v12 = vld [vmem:[#allocation5 + $0x258] sm:$0xff]  ;;  %v1402_v13 = vpack.c.bf16 %v428_v10, %v426_v9  ;;  %v430_v15 = vld [vmem:[#allocation5 + $0x240] sm:$0xff]  ;;  %s1102_s19 = scalar_lea.sflag [#allocation4], %s2131_s1  ;;  %s1898_s28 = smov [#allocation10]  }
  0x92   : > { %1399 = vmatpush1.bf16.msra.mxu0 %v1398_v7  ;;  %v1404_v14 = vpack.c.bf16 %v433_v12, %v431_v11  ;;  %v432_v16 = vld [vmem:[#allocation5 + $0x250] sm:$0xff]  ;;  %v435_v17 = vld [vmem:[#allocation5 + $0x268] sm:$0xff]  ;;  %v437_v18 = vld [vmem:[#allocation5 + $0x278] sm:$0xff]  ;;  %s1815_s30 = sshll.u32 %s1898_s28, 4  ;;  %s1816_s30 = int_to_ptr.vmem [resolvable:$false] %s1815_s30 }
  0x93   : > { %1401 = vmatprep.subr.bf16.mxu0 %v1400_v8  ;;  %v1406_v19 = vpack.c.bf16 %v432_v16, %v430_v15  ;;  %v1408_v20 = vpack.c.bf16 %v437_v18, %v435_v17  ;;  %v434_v21 = vld [vmem:[#allocation5 + $0x260] sm:$0xff]  ;;  %v436_v22 = vld [vmem:[#allocation5 + $0x270] sm:$0xff]  ;;  %v439_v23 = vld [vmem:[#allocation5 + $0x288] sm:$0xff]  ;;  %s1817_s9 = scalar_lea.vmem %s1816_s30, 512  ;;  %p1818_p12 = scmp.lt.s32.totalorder %s2176_s16, %s1816_s30 }
  0x94   : > { %v441_v24 = vld [vmem:[#allocation5 + $0x298] sm:$0xff]  ;;  %v1410_v25 = vpack.c.bf16 %v436_v22, %v434_v21  ;;  %v438_v27 = vld [vmem:[#allocation5 + $0x280] sm:$0xff]  ;;  %v440_v28 = vld [vmem:[#allocation5 + $0x290] sm:$0xff] }
  0x95   : > { %v1412_v26 = vpack.c.bf16 %v441_v24, %v439_v23  ;;  %v443_v29 = vld [vmem:[#allocation5 + $0x2a8] sm:$0xff]  ;;  %v445_v30 = vld [vmem:[#allocation5 + $0x2b8] sm:$0xff]  ;;  %v1414_v31 = vpack.c.bf16 %v440_v28, %v438_v27  ;;  %v442_v33 = vld [vmem:[#allocation5 + $0x2a0] sm:$0xff] }
  0x96   : > { %1403 = vmatpush1.bf16.msra.mxu0 %v1402_v13  ;;  %v1416_v32 = vpack.c.bf16 %v445_v30, %v443_v29  ;;  %v444_v34 = vld [vmem:[#allocation5 + $0x2b0] sm:$0xff]  ;;  %v447_v35 = vld [vmem:[#allocation5 + $0x2c8] sm:$0xff]  ;;  %v449_v36 = vld [vmem:[#allocation5 + $0x2d8] sm:$0xff] }
  0x97   : > { %1405 = vmatprep.subr.bf16.mxu0 %v1404_v14  ;;  %v359_v37 = vld [vmem:[#allocation5 + $0x8] sm:$0xff]  ;;  %v361_v38 = vld [vmem:[#allocation5 + $0x18] sm:$0xff]  ;;  %v1418_v39 = vpack.c.bf16 %v444_v34, %v442_v33  ;;  %v446_v40 = vld [vmem:[#allocation5 + $0x2c0] sm:$0xff]  ;;  %v1420_v43 = vpack.c.bf16 %v449_v36, %v447_v35 }
  0x98   : > { %v1332_v41 = vpack.c.bf16 %v361_v38, %v359_v37  ;;  %v358_v42 = vld [vmem:[#allocation5] sm:$0xff]  ;;  %v448_v44 = vld [vmem:[#allocation5 + $0x2d0] sm:$0xff]  ;;  %v451_v45 = vld [vmem:[#allocation5 + $0x2e8] sm:$0xff] }
  0x99   : > { %v360_v46 = vld [vmem:[#allocation5 + $0x10] sm:$0xff]  ;;  %v453_v47 = vld [vmem:[#allocation5 + $0x2f8] sm:$0xff]  ;;  %v363_v49 = vld [vmem:[#allocation5 + $0x28] sm:$0xff]  ;;  %v1422_v54 = vpack.c.bf16 %v448_v44, %v446_v40 }
  0x9a   : > { %1407 = vmatpush1.bf16.msra.mxu0 %v1406_v19  ;;  %1333 = vmatprep.subr.bf16.mxu1 %v1332_v41  ;;  %v1334_v48 = vpack.c.bf16 %v360_v46, %v358_v42  ;;  %v365_v50 = vld [vmem:[#allocation5 + $0x38] sm:$0xff]  ;;  %v362_v52 = vld [vmem:[#allocation5 + $0x20] sm:$0xff]  ;;  %v364_v53 = vld [vmem:[#allocation5 + $0x30] sm:$0xff]  ;;  %v1424_v58 = vpack.c.bf16 %v453_v47, %v451_v45 }
  0x9b   : > { %1409 = vmatprep.subr.bf16.mxu0 %v1408_v20  ;;  %v1336_v51 = vpack.c.bf16 %v365_v50, %v363_v49  ;;  %v450_v55 = vld [vmem:[#allocation5 + $0x2e0] sm:$0xff]  ;;  %v1338_v56 = vpack.c.bf16 %v364_v53, %v362_v52  ;;  %v347_v57 = vld [vmem:[%s2135_s22 + $0x18] sm:$0xff]  ;;  %v452_v59 = vld [vmem:[#allocation5 + $0x2f0] sm:$0xff] }
  0x9c   : > { %1335 = vmatpush1.bf16.msra.mxu1 %v1334_v48  ;;  %v367_v60 = vld [vmem:[#allocation5 + $0x48] sm:$0xff]  ;;  %v369_v61 = vld [vmem:[#allocation5 + $0x58] sm:$0xff]  ;;  %714 = vmatprep.mubr.f32.mxu0 %v347_v57  ;;  %v366_v1 = vld [vmem:[#allocation5 + $0x40] sm:$0xff]  ;;  %v1426_v3 = vpack.c.bf16 %v452_v59, %v450_v55 }
  0x9d   : > { %1337 = vmatprep.subr.bf16.mxu1 %v1336_v51  ;;  %v455_v62 = vld [vmem:[#allocation5 + $0x308] sm:$0xff]  ;;  %v457_v63 = vld [vmem:[#allocation5 + $0x318] sm:$0xff]  ;;  %v1340_v0 = vpack.c.bf16 %v369_v61, %v367_v60  ;;  %v368_v2 = vld [vmem:[#allocation5 + $0x50] sm:$0xff] }
  0x9e   : > { %1411 = vmatpush1.bf16.msra.mxu0 %v1410_v25  ;;  %v454_v4 = vld [vmem:[#allocation5 + $0x300] sm:$0xff]  ;;  %v1342_v5 = vpack.c.bf16 %v368_v2, %v366_v1  ;;  %v371_v6 = vld [vmem:[#allocation5 + $0x68] sm:$0xff]  ;;  %v373_v7 = vld [vmem:[#allocation5 + $0x78] sm:$0xff]  ;;  %v1428_v8 = vpack.c.bf16 %v457_v63, %v455_v62 }
  0x9f   : > { %1413 = vmatprep.subr.bf16.mxu0 %v1412_v26  ;;  %v456_v9 = vld [vmem:[#allocation5 + $0x310] sm:$0xff]  ;;  %v1344_v10 = vpack.c.bf16 %v373_v7, %v371_v6  ;;  %v370_v11 = vld [vmem:[#allocation5 + $0x60] sm:$0xff]  ;;  %v459_v13 = vld [vmem:[#allocation5 + $0x328] sm:$0xff] }
  0xa0   : > { %1339 = vmatpush1.bf16.msra.mxu1 %v1338_v56  ;;  %v372_v12 = vld [vmem:[#allocation5 + $0x70] sm:$0xff]  ;;  %v461_v14 = vld [vmem:[#allocation5 + $0x338] sm:$0xff]  ;;  %v375_v15 = vld [vmem:[#allocation5 + $0x88] sm:$0xff]  ;;  %v1430_v17 = vpack.c.bf16 %v456_v9, %v454_v4 }
  0xa1   : > { %1341 = vmatprep.subr.bf16.mxu1 %v1340_v0  ;;  %v377_v16 = vld [vmem:[#allocation5 + $0x98] sm:$0xff]  ;;  %v458_v18 = vld [vmem:[#allocation5 + $0x320] sm:$0xff]  ;;  %v460_v19 = vld [vmem:[#allocation5 + $0x330] sm:$0xff]  ;;  %v1346_v20 = vpack.c.bf16 %v372_v12, %v370_v11  ;;  %v1432_v21 = vpack.c.bf16 %v461_v14, %v459_v13 }
  0xa2   : > { %1415 = vmatpush1.bf16.msra.mxu0 %v1414_v31  ;;  %v463_v22 = vld [vmem:[#allocation5 + $0x348] sm:$0xff]  ;;  %v1348_v23 = vpack.c.bf16 %v377_v16, %v375_v15  ;;  %v374_v24 = vld [vmem:[#allocation5 + $0x80] sm:$0xff]  ;;  %v376_v25 = vld [vmem:[#allocation5 + $0x90] sm:$0xff]  ;;  %v1434_v29 = vpack.c.bf16 %v460_v19, %v458_v18 }
  0xa3   : > { %1417 = vmatprep.subr.bf16.mxu0 %v1416_v32  ;;  %v465_v26 = vld [vmem:[#allocation5 + $0x358] sm:$0xff]  ;;  %v379_v27 = vld [vmem:[#allocation5 + $0xa8] sm:$0xff]  ;;  %v462_v30 = vld [vmem:[#allocation5 + $0x340] sm:$0xff]  ;;  %v1350_v32 = vpack.c.bf16 %v376_v25, %v374_v24 }
  0xa4   : > { %1343 = vmatpush1.bf16.msra.mxu1 %v1342_v5  ;;  %v381_v28 = vld [vmem:[#allocation5 + $0xb8] sm:$0xff]  ;;  %v464_v31 = vld [vmem:[#allocation5 + $0x350] sm:$0xff]  ;;  %v1436_v33 = vpack.c.bf16 %v465_v26, %v463_v22  ;;  %v467_v34 = vld [vmem:[#allocation5 + $0x368] sm:$0xff] }
  0xa5   : > { %1345 = vmatprep.subr.bf16.mxu1 %v1344_v10  ;;  %v1352_v35 = vpack.c.bf16 %v381_v28, %v379_v27  ;;  %v378_v36 = vld [vmem:[#allocation5 + $0xa0] sm:$0xff]  ;;  %v380_v37 = vld [vmem:[#allocation5 + $0xb0] sm:$0xff]  ;;  %v469_v38 = vld [vmem:[#allocation5 + $0x378] sm:$0xff]  ;;  %v1438_v41 = vpack.c.bf16 %v464_v31, %v462_v30 }
  0xa6   : > { %1419 = vmatpush1.bf16.msra.mxu0 %v1418_v39  ;;  %v383_v39 = vld [vmem:[#allocation5 + $0xc8] sm:$0xff]  ;;  %v385_v40 = vld [vmem:[#allocation5 + $0xd8] sm:$0xff]  ;;  %v466_v42 = vld [vmem:[#allocation5 + $0x360] sm:$0xff]  ;;  %v1354_v44 = vpack.c.bf16 %v380_v37, %v378_v36  ;;  %v1440_v45 = vpack.c.bf16 %v469_v38, %v467_v34 }
  0xa7   : > { %1421 = vmatprep.subr.bf16.mxu0 %v1420_v43  ;;  %v468_v43 = vld [vmem:[#allocation5 + $0x370] sm:$0xff]  ;;  %v471_v46 = vld [vmem:[#allocation5 + $0x388] sm:$0xff]  ;;  %v1356_v47 = vpack.c.bf16 %v385_v40, %v383_v39  ;;  %v382_v48 = vld [vmem:[#allocation5 + $0xc0] sm:$0xff] }
  0xa8   : > { %1347 = vmatpush1.bf16.msra.mxu1 %v1346_v20  ;;  %v384_v49 = vld [vmem:[#allocation5 + $0xd0] sm:$0xff]  ;;  %v473_v50 = vld [vmem:[#allocation5 + $0x398] sm:$0xff]  ;;  %v387_v51 = vld [vmem:[#allocation5 + $0xe8] sm:$0xff]  ;;  %v1442_v53 = vpack.c.bf16 %v468_v43, %v466_v42 }
  0xa9   : > { %1349 = vmatprep.subr.bf16.mxu1 %v1348_v23  ;;  %v389_v52 = vld [vmem:[#allocation5 + $0xf8] sm:$0xff]  ;;  %v472_v55 = vld [vmem:[#allocation5 + $0x390] sm:$0xff]  ;;  %v1358_v56 = vpack.c.bf16 %v384_v49, %v382_v48  ;;  %v1444_v57 = vpack.c.bf16 %v473_v50, %v471_v46  ;;  %v386_v60 = vld [vmem:[#allocation5 + $0xe0] sm:$0xff] }
  0xaa   : > { %1423 = vmatpush1.bf16.msra.mxu0 %v1422_v54  ;;  %v470_v54 = vld [vmem:[#allocation5 + $0x380] sm:$0xff]  ;;  %v1360_v59 = vpack.c.bf16 %v389_v52, %v387_v51  ;;  %v388_v61 = vld [vmem:[#allocation5 + $0xf0] sm:$0xff]  ;;  %v477_v62 = vld [vmem:[#allocation5 + $0x3b8] sm:$0xff] }
  0xab   : > { %1425 = vmatprep.subr.bf16.mxu0 %v1424_v58  ;;  %v475_v58 = vld [vmem:[#allocation5 + $0x3a8] sm:$0xff]  ;;  %v393_v0 = vld [vmem:[#allocation5 + $0x118] sm:$0xff]  ;;  %v1446_v1 = vpack.c.bf16 %v472_v55, %v470_v54  ;;  %v474_v2 = vld [vmem:[#allocation5 + $0x3a0] sm:$0xff]  ;;  %v1362_v4 = vpack.c.bf16 %v388_v61, %v386_v60 }
  0xac   : > { %1351 = vmatpush1.bf16.msra.mxu1 %v1350_v32  ;;  %v391_v63 = vld [vmem:[#allocation5 + $0x108] sm:$0xff]  ;;  %v1448_v5 = vpack.c.bf16 %v477_v62, %v475_v58  ;;  %v392_v9 = vld [vmem:[#allocation5 + $0x110] sm:$0xff]  ;;  %v481_v10 = vld [vmem:[#allocation5 + $0x3d8] sm:$0xff] }
  0xad   : > { %1353 = vmatprep.subr.bf16.mxu1 %v1352_v35  ;;  %v479_v6 = vld [vmem:[#allocation5 + $0x3c8] sm:$0xff]  ;;  %v1364_v7 = vpack.c.bf16 %v393_v0, %v391_v63  ;;  %v397_v12 = vld [vmem:[#allocation5 + $0x138] sm:$0xff]  ;;  %v478_v14 = vld [vmem:[#allocation5 + $0x3c0] sm:$0xff] }
  0xae   : > { %1427 = vmatpush1.bf16.msra.mxu0 %v1426_v3  ;;  %v476_v3 = vld [vmem:[#allocation5 + $0x3b0] sm:$0xff]  ;;  %v395_v11 = vld [vmem:[#allocation5 + $0x128] sm:$0xff]  ;;  %v394_v20 = vld [vmem:[#allocation5 + $0x120] sm:$0xff] }
  0xaf   : > { %1429 = vmatprep.subr.bf16.mxu0 %v1428_v8  ;;  %v390_v8 = vld [vmem:[#allocation5 + $0x100] sm:$0xff]  ;;  %v1450_v13 = vpack.c.bf16 %v476_v3, %v474_v2  ;;  %v480_v15 = vld [vmem:[#allocation5 + $0x3d0] sm:$0xff]  ;;  %v483_v18 = vld [vmem:[#allocation5 + $0x3e8] sm:$0xff]  ;;  %v1368_v19 = vpack.c.bf16 %v397_v12, %v395_v11 }
  0xb0   : > { %1355 = vmatpush1.bf16.msra.mxu1 %v1354_v44  ;;  %v1366_v16 = vpack.c.bf16 %v392_v9, %v390_v8  ;;  %v485_v22 = vld [vmem:[#allocation5 + $0x3f8] sm:$0xff]  ;;  %v399_v23 = vld [vmem:[#allocation5 + $0x148] sm:$0xff]  ;;  %v1454_v25 = vpack.c.bf16 %v480_v15, %v478_v14  ;;  %v482_v26 = vld [vmem:[#allocation5 + $0x3e0] sm:$0xff] }
  0xb1   : > { %1357 = vmatprep.subr.bf16.mxu1 %v1356_v47  ;;  %v401_v24 = vld [vmem:[#allocation5 + $0x158] sm:$0xff]  ;;  %v484_v27 = vld [vmem:[#allocation5 + $0x3f0] sm:$0xff]  ;;  %v487_v30 = vld [vmem:[#allocation5 + $0x408] sm:$0xff] }
  0xb2   : > { %1431 = vmatpush1.bf16.msra.mxu0 %v1430_v17  ;;  %v1452_v17 = vpack.c.bf16 %v481_v10, %v479_v6  ;;  %v1372_v31 = vpack.c.bf16 %v401_v24, %v399_v23  ;;  %v398_v32 = vld [vmem:[#allocation5 + $0x140] sm:$0xff]  ;;  %v489_v34 = vld [vmem:[#allocation5 + $0x418] sm:$0xff]  ;;  %v403_v35 = vld [vmem:[#allocation5 + $0x168] sm:$0xff]  ;;  %v1458_v37 = vpack.c.bf16 %v484_v27, %v482_v26 }
  0xb3   : > { %1433 = vmatprep.subr.bf16.mxu0 %v1432_v21  ;;  %v396_v21 = vld [vmem:[#allocation5 + $0x130] sm:$0xff]  ;;  %v405_v36 = vld [vmem:[#allocation5 + $0x178] sm:$0xff]  ;;  %v486_v38 = vld [vmem:[#allocation5 + $0x400] sm:$0xff]  ;;  %v1460_v42 = vpack.c.bf16 %v489_v34, %v487_v30 }
  0xb4   : > { %1359 = vmatpush1.bf16.msra.mxu1 %v1358_v56  ;;  %v1370_v28 = vpack.c.bf16 %v396_v21, %v394_v20  ;;  %v488_v39 = vld [vmem:[#allocation5 + $0x410] sm:$0xff]  ;;  %v491_v40 = vld [vmem:[#allocation5 + $0x428] sm:$0xff]  ;;  %v493_v43 = vld [vmem:[#allocation5 + $0x438] sm:$0xff]  ;;  %v1376_v44 = vpack.c.bf16 %v405_v36, %v403_v35 }
  0xb5   : > { %1361 = vmatprep.subr.bf16.mxu1 %v1360_v59  ;;  %v404_v46 = vld [vmem:[#allocation5 + $0x170] sm:$0xff]  ;;  %v407_v47 = vld [vmem:[#allocation5 + $0x188] sm:$0xff]  ;;  %v409_v48 = vld [vmem:[#allocation5 + $0x198] sm:$0xff]  ;;  %v1462_v51 = vpack.c.bf16 %v488_v39, %v486_v38  ;;  %v1464_v55 = vpack.c.bf16 %v493_v43, %v491_v40 }
  0xb6   : > { %1435 = vmatpush1.bf16.msra.mxu0 %v1434_v29  ;;  %v1456_v29 = vpack.c.bf16 %v485_v22, %v483_v18  ;;  %v345_v49 = vld [vmem:[%s2135_s22 + $0x8] sm:$0xff]  ;;  %v346_v50 = vld [vmem:[%s2135_s22 + $0x10] sm:$0xff] }
  0xb7   : > { %1437 = vmatprep.subr.bf16.mxu0 %v1436_v33  ;;  %v400_v33 = vld [vmem:[#allocation5 + $0x150] sm:$0xff]  ;;  %637 = vmatprep.mubr.f32.mxu1 %v345_v49  ;;  %v490_v52 = vld [vmem:[#allocation5 + $0x420] sm:$0xff]  ;;  %v495_v56 = vld [vmem:[#allocation5 + $0x448] sm:$0xff] }
  0xb8   : > { %1363 = vmatpush1.bf16.msra.mxu1 %v1362_v4  ;;  %v406_v58 = vld [vmem:[#allocation5 + $0x180] sm:$0xff]  ;;  %v408_v59 = vld [vmem:[#allocation5 + $0x190] sm:$0xff]  ;;  %v497_v60 = vld [vmem:[#allocation5 + $0x458] sm:$0xff] }
  0xb9   : > { %1365 = vmatprep.subr.bf16.mxu1 %v1364_v7  ;;  %v411_v61 = vld [vmem:[#allocation5 + $0x1a8] sm:$0xff]  ;;  %v413_v62 = vld [vmem:[#allocation5 + $0x1b8] sm:$0xff]  ;;  %v354_v63 = vld [vmem:[%s2135_s22 + $0x50] sm:$0xff]  ;;  %v1382_v3 = vpack.c.bf16 %v408_v59, %v406_v58 }
  0xba   : > { %1439 = vmatpush1.bf16.msra.mxu0 %v1438_v41  ;;  %v1374_v41 = vpack.c.bf16 %v400_v33, %v398_v32  ;;  %v496_v2 = vld [vmem:[#allocation5 + $0x450] sm:$0xff]  ;;  %v353_v4 = vld [vmem:[%s2135_s22 + $0x48] sm:$0xff]  ;;  %v1384_v7 = vpack.c.bf16 %v413_v62, %v411_v61  ;;  %v410_v8 = vld [vmem:[#allocation5 + $0x1a0] sm:$0xff] }
  0xbb   : > { %1441 = vmatprep.subr.bf16.mxu0 %v1440_v45  ;;  %v402_v45 = vld [vmem:[#allocation5 + $0x160] sm:$0xff]  ;;  %v499_v6 = vld [vmem:[#allocation5 + $0x468] sm:$0xff]  ;;  %v412_v9 = vld [vmem:[#allocation5 + $0x1b0] sm:$0xff] }
  0xbc   : > { %1367 = vmatpush1.bf16.msra.mxu1 %v1366_v16  ;;  %v1378_v54 = vpack.c.bf16 %v404_v46, %v402_v45  ;;  %v501_v10 = vld [vmem:[#allocation5 + $0x478] sm:$0xff]  ;;  %v415_v11 = vld [vmem:[#allocation5 + $0x1c8] sm:$0xff]  ;;  %v498_v15 = vld [vmem:[#allocation5 + $0x460] sm:$0xff] }
  0xbd   : > { %1369 = vmatprep.subr.bf16.mxu1 %v1368_v19  ;;  %v417_v12 = vld [vmem:[#allocation5 + $0x1d8] sm:$0xff]  ;;  %v500_v16 = vld [vmem:[#allocation5 + $0x470] sm:$0xff]  ;;  %v1472_v18 = vpack.c.bf16 %v501_v10, %v499_v6  ;;  %v503_v19 = vld [vmem:[#allocation5 + $0x488] sm:$0xff] }
  0xbe   : > { %1443 = vmatpush1.bf16.msra.mxu0 %v1442_v53  ;;  %v492_v53 = vld [vmem:[#allocation5 + $0x430] sm:$0xff]  ;;  %v1388_v20 = vpack.c.bf16 %v417_v12, %v415_v11  ;;  %v414_v21 = vld [vmem:[#allocation5 + $0x1c0] sm:$0xff]  ;;  %v505_v23 = vld [vmem:[#allocation5 + $0x498] sm:$0xff]  ;;  %v1474_v26 = vpack.c.bf16 %v500_v16, %v498_v15 }
  0xbf   : > { %1445 = vmatprep.subr.bf16.mxu0 %v1444_v57  ;;  %v1380_v57 = vpack.c.bf16 %v409_v48, %v407_v47  ;;  %v1466_v0 = vpack.c.bf16 %v492_v53, %v490_v52  ;;  %v416_v22 = vld [vmem:[#allocation5 + $0x1d0] sm:$0xff]  ;;  %v419_v24 = vld [vmem:[#allocation5 + $0x1e8] sm:$0xff]  ;;  %v502_v27 = vld [vmem:[#allocation5 + $0x480] sm:$0xff]  ;;  %v1476_v30 = vpack.c.bf16 %v505_v23, %v503_v19 }
  0xc0   : > { %1371 = vmatpush1.bf16.msra.mxu1 %v1370_v28  ;;  %v504_v28 = vld [vmem:[#allocation5 + $0x490] sm:$0xff]  ;;  %v418_v33 = vld [vmem:[#allocation5 + $0x1e0] sm:$0xff]  ;;  %v509_v35 = vld [vmem:[#allocation5 + $0x4b8] sm:$0xff] }
  0xc1   : > { %1373 = vmatprep.subr.bf16.mxu1 %v1372_v31  ;;  %v507_v31 = vld [vmem:[#allocation5 + $0x4a8] sm:$0xff]  ;;  %v420_v34 = vld [vmem:[#allocation5 + $0x1f0] sm:$0xff]  ;;  %v1478_v38 = vpack.c.bf16 %v504_v28, %v502_v27  ;;  %v506_v39 = vld [vmem:[#allocation5 + $0x4a0] sm:$0xff] }
  0xc2   : > { %1447 = vmatpush1.bf16.msra.mxu0 %v1446_v1  ;;  %v494_v1 = vld [vmem:[#allocation5 + $0x440] sm:$0xff]  ;;  %v551_v36 = vld [vmem:[#allocation5 + $0x608] sm:$0xff]  ;;  %v1394_v40 = vpack.c.bf16 %v420_v34, %v418_v33  ;;  %v552_v45 = vld [vmem:[#allocation5 + $0x610] sm:$0xff] }
  0xc3   : > { %1449 = vmatprep.subr.bf16.mxu0 %v1448_v5  ;;  %v1468_v5 = vpack.c.bf16 %v497_v60, %v495_v56  ;;  %v1470_v14 = vpack.c.bf16 %v496_v2, %v494_v1  ;;  %v511_v46 = vld [vmem:[#allocation5 + $0x4c8] sm:$0xff]  ;;  %v513_v47 = vld [vmem:[#allocation5 + $0x4d8] sm:$0xff]  ;;  %v901_v48 = vld [vmem:[#allocation7 + $0x80] sm:$0xff] }
  0xc4   : > { %1375 = vmatpush1.bf16.msra.mxu1 %v1374_v41  ;;  %v1480_v41 = vpack.c.bf16 %v509_v35, %v507_v31  ;;  %v902_v49 = vld [vmem:[#allocation7 + $0x88] sm:$0xff]  ;;  %v1484_v53 = vpack.c.bf16 %v513_v47, %v511_v46  ;;  %v352_v58 = vld [vmem:[%s2135_s22 + $0x40] sm:$0xff]  ;;  %v521_v2 = vld [vmem:[#allocation5 + $0x518] sm:$0xff] }
  0xc5   : > { %1377 = vmatprep.subr.bf16.mxu1 %v1376_v44  ;;  %v550_v44 = vld [vmem:[#allocation5 + $0x600] sm:$0xff]  ;;  %v515_v56 = vld [vmem:[#allocation5 + $0x4e8] sm:$0xff]  ;;  %v1528_v59 = vpack.c.bf16 %v902_v49, %v901_v48  ;;  %v904_v6 = vld [vmem:[#allocation7 + $0x98] sm:$0xff] }
  0xc6   : > { %1451 = vmatpush1.bf16.msra.mxu0 %v1450_v13  ;;  %v349_v13 = vld [vmem:[%s2135_s22 + $0x28] sm:$0xff]  ;;  %v1526_v52 = vpack.c.bf16 %v552_v45, %v550_v44  ;;  %v351_v61 = vld [vmem:[%s2135_s22 + $0x38] sm:$0xff]  ;;  %v518_v11 = vld [vmem:[#allocation5 + $0x500] sm:$0xff] }
  0xc7   : > { %1453 = vmatprep.subr.bf16.mxu0 %v1452_v17  ;;  %v1386_v17 = vpack.c.bf16 %v412_v9, %v410_v8  ;;  %v519_v1 = vld [vmem:[#allocation5 + $0x508] sm:$0xff]  ;;  %v1897_v8 = vmov 0.0   ;;  %v350_v9 = vld [vmem:[%s2135_s22 + $0x30] sm:$0xff]  ;;  %v525_v15 = vld [vmem:[#allocation5 + $0x538] sm:$0xff] }
  0xc8   : > { %1379 = vmatpush1.bf16.msra.mxu1 %v1378_v54  ;;  %v510_v54 = vld [vmem:[#allocation5 + $0x4c0] sm:$0xff]  ;;  %v1492_v10 = vpack.c.bf16 %v521_v2, %v519_v1  ;;  %v520_v12 = vld [vmem:[#allocation5 + $0x510] sm:$0xff]  ;;  %v529_v28 = vld [vmem:[#allocation5 + $0x558] sm:$0xff] }
  0xc9   : > { %1381 = vmatprep.subr.bf16.mxu1 %v1380_v57  ;;  %v517_v57 = vld [vmem:[#allocation5 + $0x4f8] sm:$0xff]  ;;  %v905_v19 = vld [vmem:[#allocation7 + $0xa0] sm:$0xff]  ;;  %v890_v31 = vld [vmem:[#allocation7 + $0x28] sm:$0xff] }
  0xca   : > { %1455 = vmatpush1.bf16.msra.mxu0 %v1454_v25  ;;  %v421_v25 = vld [vmem:[#allocation5 + $0x1f8] sm:$0xff]  ;;  %v1488_v62 = vpack.c.bf16 %v517_v57, %v515_v56  ;;  %v530_v46 = vld [vmem:[#allocation5 + $0x560] sm:$0xff]  ;;  %v532_v47 = vld [vmem:[#allocation5 + $0x570] sm:$0xff] }
  0xcb   : > { %1457 = vmatprep.subr.bf16.mxu0 %v1456_v29  ;;  %v1390_v29 = vpack.c.bf16 %v416_v22, %v414_v21  ;;  %v1392_v32 = vpack.c.bf16 %v421_v25, %v419_v24  ;;  %v1494_v21 = vpack.c.bf16 %v520_v12, %v518_v11  ;;  %v357_v22 = vld [vmem:[%s2135_s22 + $0x68] sm:$0xff]  ;;  %v522_v24 = vld [vmem:[#allocation5 + $0x520] sm:$0xff]  ;;  %v524_v25 = vld [vmem:[#allocation5 + $0x530] sm:$0xff] }
  0xcc   : > { %1383 = vmatpush1.bf16.msra.mxu1 %v1382_v3  ;;  %v885_v3 = vld [vmem:[#allocation7] sm:$0xff]  ;;  %v908_v33 = vld [vmem:[#allocation7 + $0xb8] sm:$0xff]  ;;  %v1498_v34 = vpack.c.bf16 %v524_v25, %v522_v24  ;;  %v535_v49 = vld [vmem:[#allocation5 + $0x588] sm:$0xff] }
  0xcd   : > { %1385 = vmatprep.subr.bf16.mxu1 %v1384_v7  ;;  %v541_v56 = vld [vmem:[#allocation5 + $0x5b8] sm:$0xff]  ;;  %v542_v1 = vld [vmem:[#allocation5 + $0x5c0] sm:$0xff]  ;;  %v544_v2 = vld [vmem:[#allocation5 + $0x5d0] sm:$0xff] }
  0xce   : > { %1459 = vmatpush1.bf16.msra.mxu0 %v1458_v37  ;;  %v553_v37 = vld [vmem:[#allocation5 + $0x618] sm:$0xff]  ;;  %v356_v11 = vld [vmem:[%s2135_s22 + $0x60] sm:$0xff] }
  0xcf   : > { %1461 = vmatprep.subr.bf16.mxu0 %v1460_v42  ;;  %v508_v42 = vld [vmem:[#allocation5 + $0x4b0] sm:$0xff]  ;;  %v1524_v43 = vpack.c.bf16 %v553_v37, %v551_v36  ;;  %v526_v36 = vld [vmem:[#allocation5 + $0x540] sm:$0xff]  ;;  %v355_v12 = vld [vmem:[%s2135_s22 + $0x58] sm:$0xff] }
  0xd0   : > { %1387 = vmatpush1.bf16.msra.mxu1 %v1386_v17  ;;  %v887_v17 = vld [vmem:[#allocation7 + $0x10] sm:$0xff]  ;;  %v913_v25 = vld [vmem:[#allocation7 + $0xe0] sm:$0xff] }
  0xd1   : > { %715 = vmatmul.mubr.f32.vlgmr.msra.gmra.mrb[0].mxu0 %v346_v50  ;;  %1389 = vmatprep.subr.bf16.mxu1 %v1388_v20  ;;  %v1482_v50 = vpack.c.bf16 %v508_v42, %v506_v39  ;;  %v906_v20 = vld [vmem:[#allocation7 + $0xa8] sm:$0xff]  ;;  %v528_v37 = vld [vmem:[#allocation5 + $0x550] sm:$0xff] }
  0xd2   : > { %1463 = vmatpush1.bf16.msra.mxu0 %v1462_v51  ;;  %720 = vmatprep.mubr.f32.mxu0 %v354_v63  ;;  %v344_v51 = vld [vmem:[%s2135_s22] sm:$0xff]  ;;  %v1502_v44 = vpack.c.bf16 %v528_v37, %v526_v36 }
  0xd3   : > { %1465 = vmatprep.subr.bf16.mxu0 %v1464_v55  ;;  %v512_v55 = vld [vmem:[#allocation5 + $0x4d0] sm:$0xff]  ;;  %v514_v63 = vld [vmem:[#allocation5 + $0x4e0] sm:$0xff] }
  0xd4   : > { %1391 = vmatpush1.bf16.msra.mxu1 %v1390_v29  ;;  %v1486_v60 = vpack.c.bf16 %v512_v55, %v510_v54  ;;  %v1536_v29 = vpack.c.bf16 %v906_v20, %v905_v19  ;;  %v891_v42 = vld [vmem:[#allocation7 + $0x30] sm:$0xff]  ;;  %v539_v55 = vld [vmem:[#allocation5 + $0x5a8] sm:$0xff]  ;;  %v912_v20 = vld [vmem:[#allocation7 + $0xd8] sm:$0xff] }
  0xd5   : > { %721 = vmatmul.mubr.f32.gmra.mrb[2].mxu0 %v353_v4  ;;  %1393 = vmatprep.subr.bf16.mxu1 %v1392_v32  ;;  %v886_v4 = vld [vmem:[#allocation7 + $0x8] sm:$0xff]  ;;  %v907_v32 = vld [vmem:[#allocation7 + $0xb0] sm:$0xff]  ;;  %v1001_v37 = vld [vmem:[#allocation8] sm:$0xff] }
  0xd6   : > { %1467 = vmatpush1.bf16.msra.mxu0 %v1466_v0  ;;  %791 = vmatprep.mubr.f32.mxu0 %v349_v13  ;;  %v516_v0 = vld [vmem:[#allocation5 + $0x4f0] sm:$0xff]  ;;  %v523_v13 = vld [vmem:[#allocation5 + $0x528] sm:$0xff] }
  0xd7   : > { %1469 = vmatprep.subr.bf16.mxu0 %v1468_v5  ;;  %v903_v5 = vld [vmem:[#allocation7 + $0x90] sm:$0xff]  ;;  %v1490_v7 = vpack.c.bf16 %v516_v0, %v514_v63  ;;  %v1496_v23 = vpack.c.bf16 %v525_v15, %v523_v13  ;;  %v909_v13 = vld [vmem:[#allocation7 + $0xc0] sm:$0xff] }
  0xd8   : > { %1395 = vmatpush1.bf16.msra.mxu1 %v1394_v40  ;;  %v1532_v16 = vpack.c.bf16 %v904_v6, %v903_v5  ;;  %v533_v40 = vld [vmem:[#allocation5 + $0x578] sm:$0xff]  ;;  %v536_v54 = vld [vmem:[#allocation5 + $0x590] sm:$0xff]  ;;  %v1518_v5 = vpack.c.bf16 %v544_v2, %v542_v1 }
  0xd9   : > { %1525 = vmatprep.subr.bf16.mxu1 %v1524_v43  ;;  %v892_v43 = vld [vmem:[#allocation7 + $0x38] sm:$0xff]  ;;  %v911_v19 = vld [vmem:[#allocation7 + $0xd0] sm:$0xff] }
  0xda   : > { %1471 = vmatpush1.bf16.msra.mxu0 %v1470_v14  ;;  %v1530_v14 = vpack.c.bf16 %v886_v4, %v885_v3  ;;  %v1542_v48 = vpack.c.bf16 %v892_v43, %v891_v42  ;;  %v547_v3 = vld [vmem:[#allocation5 + $0x5e8] sm:$0xff]  ;;  %v549_v4 = vld [vmem:[#allocation5 + $0x5f8] sm:$0xff]  ;;  %v1003_v2 = vld [vmem:[#allocation8 + $0x10] sm:$0xff] }
  0xdb   : > { %1473 = vmatprep.subr.bf16.mxu0 %v1472_v18  ;;  %638 = vmatmul.mubr.f32.vlgmr.msra.gmra.mrb[0].mxu1 %v344_v51  ;;  %v888_v18 = vld [vmem:[#allocation7 + $0x18] sm:$0xff]  ;;  %v1506_v51 = vpack.c.bf16 %v532_v47, %v530_v46  ;;  %v1520_v6 = vpack.c.bf16 %v549_v4, %v547_v3 }
  0xdc   : > { %1527 = vmatpush1.bf16.msra.mxu1 %v1526_v52  ;;  %643 = vmatprep.mubr.f32.mxu1 %v352_v58  ;;  %v1534_v27 = vpack.c.bf16 %v888_v18, %v887_v17  ;;  %v1512_v58 = vpack.c.bf16 %v541_v56, %v539_v55  ;;  %v894_v17 = vld [vmem:[#allocation7 + $0x48] sm:$0xff]  ;;  %v1004_v3 = vld [vmem:[#allocation8 + $0x18] sm:$0xff] }
  0xdd   : > { %1529 = vmatprep.subr.bf16.mxu1 %v1528_v59  ;;  %v538_v59 = vld [vmem:[#allocation5 + $0x5a0] sm:$0xff] }
  0xde   : > { %1475 = vmatpush1.bf16.msra.mxu0 %v1474_v26  ;;  %v527_v26 = vld [vmem:[#allocation5 + $0x548] sm:$0xff] }
  0xdf   : > { %1477 = vmatprep.subr.bf16.mxu0 %v1476_v30  ;;  %644 = vmatmul.mubr.f32.gmra.mrb[2].mxu1 %v351_v61  ;;  %v889_v30 = vld [vmem:[#allocation7 + $0x20] sm:$0xff]  ;;  %v1500_v35 = vpack.c.bf16 %v529_v28, %v527_v26  ;;  %v543_v61 = vld [vmem:[#allocation5 + $0x5c8] sm:$0xff] }
  0xe0   : > { %868 = vmatprep.mubr.f32.mxu1 %v1897_v8  ;;  %v1538_v39 = vpack.c.bf16 %v890_v31, %v889_v30  ;;  %v914_v26 = vld [vmem:[#allocation7 + $0xe8] sm:$0xff]  ;;  %v897_v28 = vld [vmem:[#allocation7 + $0x60] sm:$0xff]  ;;  %v915_v31 = vld [vmem:[#allocation7 + $0xf0] sm:$0xff] }
  0xe2   : > { %1479 = vmatpush1.bf16.msra.mxu0 %v1478_v38  ;;  %v531_v38 = vld [vmem:[#allocation5 + $0x568] sm:$0xff] }
  0xe3   : > { %1481 = vmatprep.subr.bf16.mxu0 %v1480_v41  ;;  %1231 = vmatmul.mubr.msk.f32.vlgmr.msra.gmra.mrb[4].mxu1 %vm566_vm0, %v350_v9  ;;  %v1540_v41 = vpack.c.bf16 %v908_v33, %v907_v32  ;;  %v1504_v45 = vpack.c.bf16 %v533_v40, %v531_v38  ;;  %v916_v32 = vld [vmem:[#allocation7 + $0xf8] sm:$0xff]  ;;  %v1002_v38 = vld [vmem:[#allocation8 + $0x8] sm:$0xff] }
  0xe4   : > { %874 = vmatprep.mubr.f32.mxu1 %v1897_v8  ;;  %1531 = vmatpush3.bf16.msra.mxu1 %v1530_v14  ;;  %v548_v8 = vld [vmem:[#allocation5 + $0x5f0] sm:$0xff]  ;;  %v910_v14 = vld [vmem:[#allocation7 + $0xc8] sm:$0xff]  ;;  %v1556_v33 = vpack.c.bf16 %v916_v32, %v915_v31 }
  0xe5   : > { %1533 = vmatprep.subr.bf16.mxu1 %v1532_v16  ;;  %v1544_v15 = vpack.c.bf16 %v910_v14, %v909_v13  ;;  %v893_v16 = vld [vmem:[#allocation7 + $0x40] sm:$0xff]  ;;  %v1006_v13 = vld [vmem:[#allocation8 + $0x28] sm:$0xff] }
  0xe6   : > { %1483 = vmatpush1.bf16.msra.mxu0 %v1482_v50  ;;  %v537_v50 = vld [vmem:[#allocation5 + $0x598] sm:$0xff]  ;;  %v1546_v18 = vpack.c.bf16 %v894_v17, %v893_v16  ;;  %v1007_v17 = vld [vmem:[#allocation8 + $0x30] sm:$0xff] }
  0xe7   : > { %1485 = vmatprep.subr.bf16.mxu0 %v1484_v53  ;;  %1232 = vmatmul.mubr.msk.f32.gmra.mrb[6].mxu1 %vm566_vm0, %v357_v22  ;;  %v1508_v52 = vpack.c.bf16 %v537_v50, %v535_v49  ;;  %v534_v53 = vld [vmem:[#allocation5 + $0x580] sm:$0xff]  ;;  %v895_v22 = vld [vmem:[#allocation7 + $0x50] sm:$0xff] }
  0xe8   : > { %1535 = vmatpush3.bf16.msra.mxu1 %v1534_v27  ;;  %v1510_v57 = vpack.c.bf16 %v536_v54, %v534_v53  ;;  %v1552_v27 = vpack.c.bf16 %v914_v26, %v913_v25  ;;  %v1013_v26 = vld [vmem:[#allocation8 + $0x60] sm:$0xff] }
  0xe9   : > { %1537 = vmatprep.subr.bf16.mxu1 %v1536_v29  ;;  %v898_v29 = vld [vmem:[#allocation7 + $0x68] sm:$0xff] }
  0xea   : > { %1487 = vmatpush1.bf16.msra.mxu0 %v1486_v60  ;;  %v540_v60 = vld [vmem:[#allocation5 + $0x5b0] sm:$0xff]  ;;  %v1554_v30 = vpack.c.bf16 %v898_v29, %v897_v28 }
  0xeb   : > { %1489 = vmatprep.subr.bf16.mxu0 %v1488_v62  ;;  %v545_v62 = vld [vmem:[#allocation5 + $0x5d8] sm:$0xff]  ;;  %v1514_v63 = vpack.c.bf16 %v540_v60, %v538_v59  ;;  %v1015_v29 = vld [vmem:[#allocation8 + $0x70] sm:$0xff] }
  0xec   : > { %1539 = vmatpush3.bf16.msra.mxu1 %v1538_v39  ;;  %v1516_v0 = vpack.c.bf16 %v545_v62, %v543_v61  ;;  %v1560_v39 = vpack.c.bf16 %v1002_v38, %v1001_v37 }
  0xed   : > { %1541 = vmatprep.subr.bf16.mxu1 %v1540_v41 }
  0xee   : > { %1491 = vmatpush1.bf16.msra.mxu0 %v1490_v7  ;;  %v546_v7 = vld [vmem:[#allocation5 + $0x5e0] sm:$0xff] }
  0xef   : > { %1493 = vmatprep.subr.bf16.mxu0 %v1492_v10  ;;  %v1522_v9 = vpack.c.bf16 %v548_v8, %v546_v7  ;;  %v348_v10 = vld [vmem:[%s2135_s22 + $0x20] sm:$0xff]  ;;  %s1811_s22 = scalar_lea.vmem %s2176_s16, 256 }
  0xf0   : > { %1543 = vmatpush3.bf16.msra.mxu1 %v1542_v48  ;;  %v556_v48 = vlaneseq  ;;  %p1812_p10 = scmp.ne.s32.totalorder %s2176_s16, %s1811_s22  ;;  %p1819_p2 = scmp.lt.s32.totalorder %s1817_s9, %s1811_s22 }
  0xf1   : > { %1545 = vmatprep.subr.bf16.mxu1 %v1544_v15 }
  0xf2   : > { %1495 = vmatpush1.bf16.msra.mxu0 %v1494_v21  ;;  %v1548_v21 = vpack.c.bf16 %v912_v20, %v911_v19  ;;  %v557_v49 = vshrl.u32 %v556_v48, 7  ;;  %v1009_v20 = vld [vmem:[#allocation8 + $0x40] sm:$0xff]  ;;  %p1813_p3 = pnand %p1812_p10, %p2083_p5  ;;  %p1820_p1 = por %p1819_p2, %p1818_p12 }
  0xf3   : > { %1497 = vmatprep.subr.bf16.mxu0 %v1496_v23  ;;  %v896_v23 = vld [vmem:[#allocation7 + $0x58] sm:$0xff] }
  0xf4   : > { %1547 = vmatpush3.bf16.msra.mxu1 %v1546_v18  ;;  %v1550_v24 = vpack.c.bf16 %v896_v23, %v895_v22  ;;  %v558_v50 = vsub.s32 0, %v557_v49  ;;  %v1008_v18 = vld [vmem:[#allocation8 + $0x38] sm:$0xff]  ;;  %v1011_v23 = vld [vmem:[#allocation8 + $0x50] sm:$0xff]  ;;  %p1814_p7 = pneg %p1813_p3 }
  0xf5   : > { %1549 = vmatprep.subr.bf16.mxu1 %v1548_v21  ;;  %v1572_v19 = vpack.c.bf16 %v1008_v18, %v1007_v17  ;;  %v1010_v21 = vld [vmem:[#allocation8 + $0x48] sm:$0xff] }
  0xf6   : > { %1499 = vmatpush1.bf16.msra.mxu0 %v1498_v34  ;;  %v899_v34 = vld [vmem:[#allocation7 + $0x70] sm:$0xff]  ;;  %v1576_v22 = vpack.c.bf16 %v1010_v21, %v1009_v20  ;;  %p1821_p4 = pnand %p1820_p1, %p1814_p7 }
  0xf7   : > { %1501 = vmatprep.subr.bf16.mxu0 %v1500_v35  ;;  %v900_v35 = vld [vmem:[#allocation7 + $0x78] sm:$0xff] }
  0xf8   : > { %1551 = vmatpush3.bf16.msra.mxu1 %v1550_v24  ;;  %v1558_v36 = vpack.c.bf16 %v900_v35, %v899_v34  ;;  %v1012_v24 = vld [vmem:[#allocation8 + $0x58] sm:$0xff] }
  0xf9   : > { %1553 = vmatprep.subr.bf16.mxu1 %v1552_v27  ;;  %v1580_v25 = vpack.c.bf16 %v1012_v24, %v1011_v23  ;;  %v1014_v27 = vld [vmem:[#allocation8 + $0x68] sm:$0xff] }
  0xfa   : > { %1503 = vmatpush1.bf16.msra.mxu0 %v1502_v44  ;;  %v1584_v28 = vpack.c.bf16 %v1014_v27, %v1013_v26 }
  0xfb   : > { %1505 = vmatprep.subr.bf16.mxu0 %v1504_v45 }
  0xfc   : > { %1555 = vmatpush3.bf16.msra.mxu1 %v1554_v30  ;;  %v1016_v30 = vld [vmem:[#allocation8 + $0x78] sm:$0xff] }
  0xfd   : > { %1557 = vmatprep.subr.bf16.mxu1 %v1556_v33  ;;  %v1588_v31 = vpack.c.bf16 %v1016_v30, %v1015_v29  ;;  %v1233_v33 = vld [vmem:[%s2229_s4] ss:$0 sm:$0xff] }
  0xfe   : > { %1507 = vmatpush1.bf16.msra.mxu0 %v1506_v51  ;;  %v554_v51 = vld [vmem:[%s2227_s2] sm:$0x3] }
  0xff   : > { %1509 = vmatprep.subr.bf16.mxu0 %v1508_v52  ;;  %v562_v52 = vsub.s32 1, %v557_v49  ;;  %v559_v53 = vrot.slane %v554_v51, %v558_v50 }
 0x100   : > { %1559 = vmatpush3.bf16.msra.mxu1 %v1558_v36 }
 0x101   : > { %1561 = vmatprep.subr.bf16.mxu1 %v1560_v39  ;;  %v563_v54 = vrot.slane %v554_v51, %v562_v52 }
 0x102   : > { %1511 = vmatpush1.bf16.msra.mxu0 %v1510_v57 }
 0x103   : > { %1513 = vmatprep.subr.bf16.mxu0 %v1512_v58 }
 0x106   : > { %1515 = vmatpush1.bf16.msra.mxu0 %v1514_v63 }
 0x107   : > { %1517 = vmatprep.subr.bf16.mxu0 %v1516_v0 }
 0x10a   : > { %1519 = vmatpush1.bf16.msra.mxu0 %v1518_v5 }
 0x10b   : > { %1521 = vmatprep.subr.bf16.mxu0 %v1520_v6 }
 0x10e   : > { %1523 = vmatpush1.bf16.msra.mxu0 %v1522_v9 }
 0x111   : > { %792 = vmatmul.mubr.f32.vlgmr.msra.gmra.mrb[0].mxu0 %v348_v10  ;;  %v1564_v10 = vpack.c.bf16 %v1004_v3, %v1003_v2 }
 0x112   : > { %797 = vmatprep.mubr.f32.mxu0 %v356_v11 }
 0x115   : > { %798 = vmatmul.mubr.f32.gmra.mrb[2].mxu0 %v355_v12  ;;  %v1005_v12 = vld [vmem:[#allocation8 + $0x20] sm:$0xff] }
 0x116   : > { %v1568_v16 = vpack.c.bf16 %v1006_v13, %v1005_v12 }
 0x1ae   : > { %v639_v40 = vpop.f32.mrb[0].mxu1 }
 0x1af   : > { %v641_v41 = vpop.f32.mrb[1].mxu1  ;;  %v640_v55 = vadd.f32 %v639_v40, %v559_v53 }
 0x1b0   : > { %v642_v56 = vadd.f32 %v641_v41, %v563_v54 }
 0x1b2   : > { %v645_v42 = vpop.f32.mrb[2].mxu1 }
 0x1b3   : > { %v647_v43 = vpop.f32.mrb[3].mxu1  ;;  %v646_v61 = vadd.f32 %v645_v42, %v559_v53 }
 0x1b4   : > { %v648_v63 = vadd.f32 %v647_v43, %v563_v54  ;;  %v1234_v43 = vld [vmem:[%s2231_s6] ss:$0 sm:$0xff] }
 0x1b6   : > { %v870_v44 = vpop.f32.mrb[4].mxu1 }
 0x1b7   : > { %v872_v45 = vpop.f32.mrb[5].mxu1 }
 0x1ba   : > { %v876_v46 = vpop.f32.mrb[6].mxu1 }
 0x1bb   : > { %v878_v47 = vpop.f32.mrb[7].mxu1 }
 0x1e4   : > { %v793_v57 = vpop.f32.mrb[0].mxu0 }
 0x1e5   : > { %v1593_v58 = vadd.f32 %v793_v57, %v640_v55  ;;  %v795_v59 = vpop.f32.mrb[1].mxu0 }
 0x1e6   : > { %v1596_v60 = vadd.f32 %v795_v59, %v642_v56 }
 0x1e7   : > { %v1594_v62 = vadd.f32 %v1593_v58, %v870_v44 }
 0x1e8   : > { %v1597_v0 = vadd.f32 %v1596_v60, %v872_v45  ;;  %v799_v1 = vpop.f32.mrb[2].mxu0 }
 0x1e9   : > { %v1599_v4 = vadd.f32 %v799_v1, %v646_v61  ;;  %v801_v5 = vpop.f32.mrb[3].mxu0  ;;  %v881_v8 = vmax.f32 %v1594_v62, 0.0 }
 0x1ea   : > { %v882_v6 = vmax.f32 %v1597_v0, 0.0  ;;  %v1602_v7 = vadd.f32 %v801_v5, %v648_v63 }
 0x1eb   : > { %v1600_v9 = vadd.f32 %v1599_v4, %v876_v46 }
 0x1ec   : > { %v1603_v11 = vadd.f32 %v1602_v7, %v878_v47  ;;  %988 = vmatprep.mubr.f32.mxu1 %v882_v6 }
 0x1ed   : > { %989 = vmatmul.mubr.f32.vlgmr.msra.gmra.mrb[8].mxu1 %v881_v8  ;;  %v883_v15 = vmax.f32 %v1600_v9, 0.0 }
 0x1ee   : > { %v884_v14 = vmax.f32 %v1603_v11, 0.0  ;;  %1563 = vmatpush3.bf16.msra.mxu1 %v1560_v39 }
 0x1ef   : > { %1565 = vmatprep.subr.bf16.mxu1 %v1564_v10 }
 0x1f0   : > { %993 = vmatprep.mubr.f32.mxu1 %v884_v14 }
 0x1f1   : > { %994 = vmatmul.mubr.f32.gmra.mrb[10].mxu1 %v883_v15 }
 0x1f2   : > { %1567 = vmatpush3.bf16.msra.mxu1 %v1564_v10 }
 0x1f3   : > { %1569 = vmatprep.subr.bf16.mxu1 %v1568_v16 }
 0x1f6   : > { %1571 = vmatpush3.bf16.msra.mxu1 %v1568_v16 }
 0x1f7   : > { %1573 = vmatprep.subr.bf16.mxu1 %v1572_v19 }
 0x1fa   : > { %1575 = vmatpush3.bf16.msra.mxu1 %v1572_v19 }
 0x1fb   : > { %1577 = vmatprep.subr.bf16.mxu1 %v1576_v22 }
 0x1fe   : > { %1579 = vmatpush3.bf16.msra.mxu1 %v1576_v22 }
 0x1ff   : > { %1581 = vmatprep.subr.bf16.mxu1 %v1580_v25 }
 0x202   : > { %1583 = vmatpush3.bf16.msra.mxu1 %v1580_v25 }
 0x203   : > { %1585 = vmatprep.subr.bf16.mxu1 %v1584_v28 }
 0x206   : > { %1587 = vmatpush3.bf16.msra.mxu1 %v1584_v28 }
 0x207   : > { %1589 = vmatprep.subr.bf16.mxu1 %v1588_v31 }
 0x20a   : > { %1591 = vmatpush3.bf16.msra.mxu1 %v1588_v31 }
 0x2c0   : > { %v1273_v32 = vpop.f32.mrb[8].mxu1 }
 0x2c1   : > { %v1274_v34 = vpop.f32.mrb[9].mxu1 }
 0x2c2   : > { %v1275_v35 = vadd.f32 %v1274_v34, %v1273_v32 }
 0x2c4   : > { %v991_v36 = vadd.f32 %v1275_v35, %v1233_v33  ;;  %v1276_v37 = vpop.f32.mrb[10].mxu1 }
 0x2c5   : > { %v1277_v38 = vpop.f32.mrb[11].mxu1 }
 0x2c6   : > { %v999_v39 = vmax.f32 %v991_v36, 0.0  ;;  %v1278_v40 = vadd.f32 %v1277_v38, %v1276_v37 }
 0x2c8   : > { %v996_v41 = vadd.f32 %v1278_v40, %v1233_v33  ;;  %1329 = vmatprep.mubr.f32.mxu1 %v999_v39 }
 0x2ca   : > { %v1000_v42 = vmax.f32 %v996_v41, 0.0 }
 0x2cc   : > { %1330 = vmatmul.mubr.f32.vlgmr.msra.gmra.mrb[12].mxu1 %v1000_v42 }
 0x39f   : > { %v1331_v44 = vpop.f32.mrb[12].mxu1 }
 0x3a0   : > { %v1096_v45 = vadd.f32 %v1331_v44, %v1234_v43  ;;  %v1090_v46 = vpop.f32.mrb[13].mxu1 }
 0x3a1   : > { %v1091_v47 = vadd.f32 %v1234_v43, %v1090_v46 }
 0x3a2   : > { %1100 = vst [vmem:[%s341_s14 + $0x8] sm:$0xff] %v1096_v45 }
 0x3a3   : > { %1099 = vst [vmem:[%s341_s14] sm:$0xff] %v1091_v47 }
 0x3a4   : > { %1824 = shalt.err (!%p1821_p4)
}
 0x3a5   : > { %s1825_s29 = scalar_lea.hbm %s2181_s8, 256  ;;  %s1829_s14 = scalar_lea.hbm %s2232_s7, 512 }
 0x3a6   : > { %p1826_p9 = scmp.ne.s32.totalorder %s2181_s8, %s1825_s29  ;;  %p1830_p8 = scmp.lt.u32.totalorder %s2181_s8, %s2232_s7 }
 0x3a7   : > { %p1831_p13 = scmp.lt.u32.totalorder %s1829_s14, %s1825_s29  ;;  %p1833_p10 = scmp.lt.u32.totalorder %s1825_s29, %s2181_s8 }
 0x3a8   : > { %p1827_p0 = pnand %p1826_p9, %p2083_p5 }
 0x3a9   : > { %p1832_p6 = por %p1831_p13, %p1830_p8 }
 0x3aa   : > { %p1828_p11 = pneg %p1827_p0 }
 0x3ab   : > { %p1834_p3 = por %p1833_p10, %p1832_p6 }
 0x3ad   : > { %p1835_p7 = pnand %p1834_p3, %p1828_p11 }
 0x3af   : > { %1838 = shalt.err (!%p1835_p7)
}
 0x3b0   : > { %s1899_s17 = smov 128   ;;  %s1900_s13 = smov 8  }
 0x3b1   : > { %1625 = dma.vmem_to_hbm [thread:$0]  (%p2083_p5), %s2176_s16, 256, %s2181_s8, %s1102_s19, %s1899_s17, %s1899_s17, %s1900_s13  }
 0x3b2 PF: > { %s2254_s15 = sld [smem:[#allocation15_spill]]  ;;  %s1130_s22 = sand.u32 1, %s1873_s24  }
 0x3b3   : > { %p2256_p2 = scmp.ge.s32.totalorder %s1885_s27, 2  ;;  %s1131_s28 = scalar_lea.sflag [#allocation4], %s1130_s22 }
 0x3b8   : > { %p2255_p12 = scmp.ne.s32.totalorder %s2254_s15, 0 }
 0x3ba   : > { %p1642_p1 = pnand %p2256_p2, %p2255_p12 }
 0x3bc   : > { %1868 = dma.done.wait (!%p1642_p1), %s1131_s28, 256  }
 0x3bd   : > { %1870 = vsyncadd (!%p1642_p1), %s1131_s28, 4294967040  ;;  %p22_p4 = scmp.ge.s32.totalorder %s2051_s18, 4   ;;  %s2257_s24 = smov %s1877_s25 }
 0x3be   : > { %s2258_s25 = smov %s1881_s26  ;;  %s2259_s26 = smov %s2079_s12 }
 0x3bf   : > { %s2260_s27 = smov %s2051_s18  ;;  %24 = sbr.rel (!%p22_p4) target bundleno = 9 (0x9), region = 105 }
 0x3c6   :  { %1136 = vsyncpa [#allocation3], 1 }
 0x3c7   :  { %1138 = vsyncpa [#allocation3 + $0x1], 1 }
 0x3c8   :  { %1139 = vsyncpa [#allocation6], 1 }
 0x3c9   :  { %1140 = vsyncpa [#allocation9], 1 }
 0x3ca   :  { %1141 = vsyncpa [#allocation4], 1 }
 0x3cb   :  { %1143 = vsyncpa [#allocation4 + $0x1], 1 }

</bundles_post_ra>
